<compile_context>
chip_gen: v6e
topology: v6e:2x2x1
jax: 0.10.0
libtpu: 0.0.40
codegen_flags: <defaults>
</compile_context>

<pallas_src>
import jax
import jax.numpy as jnp
from jax.experimental import pallas as pl
from jax.experimental.pallas import tpu as pltpu

# Plain Python floats: folded into the kernel body, never captured as array constants.
SELU_ALPHA = 1.6732632423543772
SELU_SCALE = 1.0507009873554805
NEG_BIG = -1e30          # "minus infinity" bias for padded class lanes
LANES = 128              # lane width -> lane-dense output slab
MAX_TILE_ROWS = 2048     # cap per-step tile; activations stay tiny in VMEM


def _cdiv(a, b):
    return -(-a // b)


def _round_up(n, m):
    return _cdiv(n, m) * m


def _selu(x):
    # f32 elementwise path (portable across v5e/v6e/v7x).
    return SELU_SCALE * jnp.where(x > 0, x, SELU_ALPHA * (jnp.exp(x) - 1.0))


def _mlp_kernel(x_ref,
                w1_ref, b1_ref,
                w2_ref, b2_ref,
                w3_ref, b3_ref,
                w4_ref, b4_ref,
                out_ref):
    # bf16 operands into the MXU, f32 accumulation, f32 elementwise.
    x = x_ref[...].astype(jnp.bfloat16)                                   # (TM, F)

    h = _selu(jnp.dot(x, w1_ref[...], preferred_element_type=jnp.float32) + b1_ref[...])
    h = _selu(jnp.dot(h.astype(jnp.bfloat16), w2_ref[...],
                      preferred_element_type=jnp.float32) + b2_ref[...])
    h = _selu(jnp.dot(h.astype(jnp.bfloat16), w3_ref[...],
                      preferred_element_type=jnp.float32) + b3_ref[...])

    # (TM, 128) padded logits; padded lanes carry a ~-1e30 bias.
    logits = jnp.dot(h.astype(jnp.bfloat16), w4_ref[...],
                     preferred_element_type=jnp.float32) + b4_ref[...]

    # Numerically stable softmax over the 128 padded class lanes.
    # exp(-1e30 - m) underflows to exactly 0, so padded lanes don't affect normalization.
    m = jnp.max(logits, axis=-1, keepdims=True)
    e = jnp.exp(logits - m)
    denom = jnp.sum(e, axis=-1, keepdims=True)
    out_ref[...] = e * pl.reciprocal(denom, approx=True)


def _choose_tm(batch):
    """Pick a batch tile: multiple of 8, <= MAX_TILE_ROWS, >=2 grid steps when possible."""
    b8 = _round_up(batch, 8)
    n_steps = _cdiv(b8, MAX_TILE_ROWS)
    if b8 >= 16:
        n_steps = max(n_steps, 2)   # >=2 steps -> both v7x TensorCores get work
    return _round_up(_cdiv(b8, n_steps), 8)


def neural_network_forward(x, params, *, tm=None, padded_output=False):
    """x: (B, input_size) float32; params: dict of f32 weights (in,out) and biases (1,out).

    padded_output=True returns the lane-dense (B, 128) slab (padded classes have prob 0),
    letting the consumer defer/skip the column slice.
    """
    B, F_in = x.shape
    C = params["w4"].shape[1]
    C_pad = _round_up(max(C, LANES), LANES)

    # Weights -> bf16 once (tiny, one-time). Biases stay f32 (added to f32 accumulators).
    w1 = params["w1"].astype(jnp.bfloat16)
    w2 = params["w2"].astype(jnp.bfloat16)
    w3 = params["w3"].astype(jnp.bfloat16)
    # Pad the classifier to 128 lanes: padded weight cols = 0, padded bias = -1e30.
    w4 = (jnp.zeros((params["w4"].shape[0], C_pad), jnp.float32)
          .at[:, :C].set(params["w4"])).astype(jnp.bfloat16)
    b4 = jnp.full((1, C_pad), NEG_BIG, jnp.float32).at[:, :C].set(params["b4"])

    if tm is None:
        tm = _choose_tm(B)
    Bp = _round_up(B, tm)
    if Bp != B:
        # Only a handful of rows (< tm); never a full extra pass for 8-aligned batches.
        x = jnp.pad(x, ((0, Bp - B), (0, 0)))
    grid = (Bp // tm,)

    row = lambda i: (i, 0)     # x / out tiles walk the batch dim
    const = lambda i: (0, 0)   # weights/biases: same block every step -> stay VMEM-resident

    args = (
        x,
        w1, params["b1"],
        w2, params["b2"],
        w3, params["b3"],
        w4, b4,
    )

    in_specs = [pl.BlockSpec((tm, F_in), row)]
    for a in args[1:]:
        in_specs.append(pl.BlockSpec(a.shape, const))

    out = pl.pallas_call(
        _mlp_kernel,
        out_shape=jax.ShapeDtypeStruct((Bp, C_pad), jnp.float32),
        grid=grid,
        in_specs=in_specs,
        out_specs=pl.BlockSpec((tm, C_pad), row),
        compiler_params=pltpu.CompilerParams(dimension_semantics=("parallel",)),
    )(*args)

    if padded_output:
        return out[:B]
    return out[:B, :C]


def init_params(key, input_size, num_classes):
    """PyTorch-Linear-style init (uniform +/- 1/sqrt(fan_in)), weights stored (in, out)."""
    dims = [(input_size, 64), (64, 128), (128, 64), (64, num_classes)]
    params = {}
    for i, (fan_in, fan_out) in enumerate(dims, start=1):
        key, kw, kb = jax.random.split(key, 3)
        bound = 1.0 / jnp.sqrt(float(fan_in))
        params[f"w{i}"] = jax.random.uniform(kw, (fan_in, fan_out), jnp.float32, -bound, bound)
        params[f"b{i}"] = jax.random.uniform(kb, (1, fan_out), jnp.float32, -bound, bound)
    return params


def _reference_forward(x, params):
    h = x
    for i in (1, 2, 3):
        h = _selu(h @ params[f"w{i}"] + params[f"b{i}"])
    logits = h @ params["w4"] + params["b4"]
    return jax.nn.softmax(logits, axis=-1)


if __name__ == "__main__":
    # Small shapes consistent with a tabular crop-classification MLP.
    # TODO(synk): the npz mean/std normalization in the original script is data
    # preprocessing outside Neural_network.forward and is not part of the kernel.
    batch = 8
    input_size = 16
    num_classes = 8

    key = jax.random.PRNGKey(0)
    key, kx = jax.random.split(key)
    x = jax.random.normal(kx, (batch, input_size), jnp.float32)

    params = init_params(key, input_size, num_classes)

    out = neural_network_forward(x, params)
    out = jax.block_until_ready(out)

    ref = _reference_forward(x, params)
    assert out.shape == (batch, num_classes)
    # Tolerance covers bf16 MXU operands + EUP approximate reciprocal in the softmax.
    assert jnp.allclose(out, ref, atol=3e-2, rtol=3e-2), "mismatch vs reference"
    assert jnp.allclose(jnp.sum(out, axis=-1), 1.0, atol=1e-2), "softmax rows must sum to 1"

    print("KERNEL_OK")
</pallas_src>

<mosaic_0001>
module attributes {stable_mosaic.version = 11 : i64} {
  func.func @_mlp_kernel(%arg0: i32, %arg1: memref<8x16xf32, #tpu.memory_space<vmem>>, %arg2: memref<16x64xbf16, #tpu.memory_space<vmem>>, %arg3: memref<1x64xf32, #tpu.memory_space<vmem>>, %arg4: memref<64x128xbf16, #tpu.memory_space<vmem>>, %arg5: memref<1x128xf32, #tpu.memory_space<vmem>>, %arg6: memref<128x64xbf16, #tpu.memory_space<vmem>>, %arg7: memref<1x64xf32, #tpu.memory_space<vmem>>, %arg8: memref<64x128xbf16, #tpu.memory_space<vmem>>, %arg9: memref<1x128xf32, #tpu.memory_space<vmem>>, %arg10: memref<8x128xf32, #tpu.memory_space<vmem>>) attributes {dimension_semantics = [#tpu.dimension_semantics<parallel>], iteration_bounds = array<i64: 1>, scalar_prefetch = 0 : i64, scratch_operands = 0 : i64, tpu.core_type = #tpu.core_type<tc>, window_params = [{transform_indices = @transform_0, window_bounds = array<i64: 8, 16>}, {pipeline_mode = #tpu.pipeline_mode<synchronous>, transform_indices = @transform_1, window_bounds = array<i64: 16, 64>}, {pipeline_mode = #tpu.pipeline_mode<synchronous>, transform_indices = @transform_2, window_bounds = array<i64: 1, 64>}, {pipeline_mode = #tpu.pipeline_mode<synchronous>, transform_indices = @transform_3, window_bounds = array<i64: 64, 128>}, {pipeline_mode = #tpu.pipeline_mode<synchronous>, transform_indices = @transform_4, window_bounds = array<i64: 1, 128>}, {pipeline_mode = #tpu.pipeline_mode<synchronous>, transform_indices = @transform_5, window_bounds = array<i64: 128, 64>}, {pipeline_mode = #tpu.pipeline_mode<synchronous>, transform_indices = @transform_6, window_bounds = array<i64: 1, 64>}, {pipeline_mode = #tpu.pipeline_mode<synchronous>, transform_indices = @transform_7, window_bounds = array<i64: 64, 128>}, {pipeline_mode = #tpu.pipeline_mode<synchronous>, transform_indices = @transform_8, window_bounds = array<i64: 1, 128>}, {transform_indices = @transform_9, window_bounds = array<i64: 8, 128>}]} {
    %c0 = arith.constant 0 : index
    %c0_0 = arith.constant 0 : index
    %0 = vector.load %arg1[%c0, %c0_0] : memref<8x16xf32, #tpu.memory_space<vmem>>, vector<8x16xf32>
    %1 = arith.truncf %0 : vector<8x16xf32> to vector<8x16xbf16>
    %c0_1 = arith.constant 0 : index
    %c0_2 = arith.constant 0 : index
    %2 = vector.load %arg2[%c0_1, %c0_2] : memref<16x64xbf16, #tpu.memory_space<vmem>>, vector<16x64xbf16>
    %cst = arith.constant dense<0.000000e+00> : vector<8x64xf32>
    %3 = tpu.matmul %1, %2, %cst {dimension_numbers = #tpu.dot_dimension_numbers<[1], [0], [0], [1], [0, 0, 1, 1], [], []>} : vector<8x16xbf16>, vector<16x64xbf16>, vector<8x64xf32> -> vector<8x64xf32>
    %c0_3 = arith.constant 0 : index
    %c0_4 = arith.constant 0 : index
    %4 = vector.load %arg3[%c0_3, %c0_4] : memref<1x64xf32, #tpu.memory_space<vmem>>, vector<1x64xf32>
    %5 = vector.broadcast %4 : vector<1x64xf32> to vector<8x64xf32>
    %6 = arith.addf %3, %5 : vector<8x64xf32>
    %cst_5 = arith.constant 0.000000e+00 : f32
    %7 = vector.broadcast %cst_5 : f32 to vector<8x64xf32>
    %8 = arith.cmpf ogt, %6, %7 : vector<8x64xf32>
    %9 = math.exp %6 : vector<8x64xf32>
    %cst_6 = arith.constant 1.000000e+00 : f32
    %10 = vector.broadcast %cst_6 : f32 to vector<8x64xf32>
    %11 = arith.subf %9, %10 : vector<8x64xf32>
    %cst_7 = arith.constant 1.67326319 : f32
    %12 = vector.broadcast %cst_7 : f32 to vector<8x64xf32>
    %13 = arith.mulf %12, %11 : vector<8x64xf32>
    %14 = arith.select %8, %6, %13 : vector<8x64xi1>, vector<8x64xf32>
    %cst_8 = arith.constant 1.05070102 : f32
    %15 = vector.broadcast %cst_8 : f32 to vector<8x64xf32>
    %16 = arith.mulf %15, %14 : vector<8x64xf32>
    %17 = arith.truncf %16 : vector<8x64xf32> to vector<8x64xbf16>
    %c0_9 = arith.constant 0 : index
    %c0_10 = arith.constant 0 : index
    %18 = vector.load %arg4[%c0_9, %c0_10] : memref<64x128xbf16, #tpu.memory_space<vmem>>, vector<64x128xbf16>
    %cst_11 = arith.constant dense<0.000000e+00> : vector<8x128xf32>
    %19 = tpu.matmul %17, %18, %cst_11 {dimension_numbers = #tpu.dot_dimension_numbers<[1], [0], [0], [1], [0, 0, 1, 1], [], []>} : vector<8x64xbf16>, vector<64x128xbf16>, vector<8x128xf32> -> vector<8x128xf32>
    %c0_12 = arith.constant 0 : index
    %c0_13 = arith.constant 0 : index
    %20 = vector.load %arg5[%c0_12, %c0_13] : memref<1x128xf32, #tpu.memory_space<vmem>>, vector<1x128xf32>
    %21 = vector.broadcast %20 : vector<1x128xf32> to vector<8x128xf32>
    %22 = arith.addf %19, %21 : vector<8x128xf32>
    %cst_14 = arith.constant 0.000000e+00 : f32
    %23 = vector.broadcast %cst_14 : f32 to vector<8x128xf32>
    %24 = arith.cmpf ogt, %22, %23 : vector<8x128xf32>
    %25 = math.exp %22 : vector<8x128xf32>
    %cst_15 = arith.constant 1.000000e+00 : f32
    %26 = vector.broadcast %cst_15 : f32 to vector<8x128xf32>
    %27 = arith.subf %25, %26 : vector<8x128xf32>
    %cst_16 = arith.constant 1.67326319 : f32
    %28 = vector.broadcast %cst_16 : f32 to vector<8x128xf32>
    %29 = arith.mulf %28, %27 : vector<8x128xf32>
    %30 = arith.select %24, %22, %29 : vector<8x128xi1>, vector<8x128xf32>
    %cst_17 = arith.constant 1.05070102 : f32
    %31 = vector.broadcast %cst_17 : f32 to vector<8x128xf32>
    %32 = arith.mulf %31, %30 : vector<8x128xf32>
    %33 = arith.truncf %32 : vector<8x128xf32> to vector<8x128xbf16>
    %c0_18 = arith.constant 0 : index
    %c0_19 = arith.constant 0 : index
    %34 = vector.load %arg6[%c0_18, %c0_19] : memref<128x64xbf16, #tpu.memory_space<vmem>>, vector<128x64xbf16>
    %cst_20 = arith.constant dense<0.000000e+00> : vector<8x64xf32>
    %35 = tpu.matmul %33, %34, %cst_20 {dimension_numbers = #tpu.dot_dimension_numbers<[1], [0], [0], [1], [0, 0, 1, 1], [], []>} : vector<8x128xbf16>, vector<128x64xbf16>, vector<8x64xf32> -> vector<8x64xf32>
    %c0_21 = arith.constant 0 : index
    %c0_22 = arith.constant 0 : index
    %36 = vector.load %arg7[%c0_21, %c0_22] : memref<1x64xf32, #tpu.memory_space<vmem>>, vector<1x64xf32>
    %37 = vector.broadcast %36 : vector<1x64xf32> to vector<8x64xf32>
    %38 = arith.addf %35, %37 : vector<8x64xf32>
    %cst_23 = arith.constant 0.000000e+00 : f32
    %39 = vector.broadcast %cst_23 : f32 to vector<8x64xf32>
    %40 = arith.cmpf ogt, %38, %39 : vector<8x64xf32>
    %41 = math.exp %38 : vector<8x64xf32>
    %cst_24 = arith.constant 1.000000e+00 : f32
    %42 = vector.broadcast %cst_24 : f32 to vector<8x64xf32>
    %43 = arith.subf %41, %42 : vector<8x64xf32>
    %cst_25 = arith.constant 1.67326319 : f32
    %44 = vector.broadcast %cst_25 : f32 to vector<8x64xf32>
    %45 = arith.mulf %44, %43 : vector<8x64xf32>
    %46 = arith.select %40, %38, %45 : vector<8x64xi1>, vector<8x64xf32>
    %cst_26 = arith.constant 1.05070102 : f32
    %47 = vector.broadcast %cst_26 : f32 to vector<8x64xf32>
    %48 = arith.mulf %47, %46 : vector<8x64xf32>
    %49 = arith.truncf %48 : vector<8x64xf32> to vector<8x64xbf16>
    %c0_27 = arith.constant 0 : index
    %c0_28 = arith.constant 0 : index
    %50 = vector.load %arg8[%c0_27, %c0_28] : memref<64x128xbf16, #tpu.memory_space<vmem>>, vector<64x128xbf16>
    %cst_29 = arith.constant dense<0.000000e+00> : vector<8x128xf32>
    %51 = tpu.matmul %49, %50, %cst_29 {dimension_numbers = #tpu.dot_dimension_numbers<[1], [0], [0], [1], [0, 0, 1, 1], [], []>} : vector<8x64xbf16>, vector<64x128xbf16>, vector<8x128xf32> -> vector<8x128xf32>
    %c0_30 = arith.constant 0 : index
    %c0_31 = arith.constant 0 : index
    %52 = vector.load %arg9[%c0_30, %c0_31] : memref<1x128xf32, #tpu.memory_space<vmem>>, vector<1x128xf32>
    %53 = vector.broadcast %52 : vector<1x128xf32> to vector<8x128xf32>
    %54 = arith.addf %51, %53 : vector<8x128xf32>
    %cst_32 = arith.constant dense<0xFF800000> : vector<8xf32>
    %55 = vector.multi_reduction <maximumf>, %54, %cst_32 [1] : vector<8x128xf32> to vector<8xf32>
    %56 = vector.shape_cast %55 : vector<8xf32> to vector<8x1xf32>
    %57 = vector.broadcast %56 : vector<8x1xf32> to vector<8x128xf32>
    %58 = arith.subf %54, %57 : vector<8x128xf32>
    %59 = math.exp %58 : vector<8x128xf32>
    %cst_33 = arith.constant dense<0.000000e+00> : vector<8xf32>
    %60 = vector.multi_reduction <add>, %59, %cst_33 [1] : vector<8x128xf32> to vector<8xf32>
    %61 = vector.shape_cast %60 : vector<8xf32> to vector<8x1xf32>
    %62 = tpu.reciprocal %61 {approx = true} : vector<8x1xf32> -> vector<8x1xf32>
    %63 = vector.broadcast %62 : vector<8x1xf32> to vector<8x128xf32>
    %64 = arith.mulf %59, %63 : vector<8x128xf32>
    %c0_34 = arith.constant 0 : index
    %c0_35 = arith.constant 0 : index
    %65 = vector.load %arg10[%c0_34, %c0_35] : memref<8x128xf32, #tpu.memory_space<vmem>>, vector<8x128xf32>
    tpu.vector_store %arg10[%c0_34, %c0_35], %64 {strides = array<i32>} : memref<8x128xf32, #tpu.memory_space<vmem>>, vector<8x128xf32>,
    return
  }
  func.func @transform_0(%arg0: i32) -> (i32, i32) {
    %c0_i32 = arith.constant 0 : i32
    %c0_i32_0 = arith.constant 0 : i32
    return %arg0, %c0_i32 : i32, i32
  }
  func.func @transform_1(%arg0: i32) -> (i32, i32) {
    %c0_i32 = arith.constant 0 : i32
    %c0_i32_0 = arith.constant 0 : i32
    %c0_i32_1 = arith.constant 0 : i32
    return %c0_i32, %c0_i32_0 : i32, i32
  }
  func.func @transform_2(%arg0: i32) -> (i32, i32) {
    %c0_i32 = arith.constant 0 : i32
    %c0_i32_0 = arith.constant 0 : i32
    %c0_i32_1 = arith.constant 0 : i32
    return %c0_i32, %c0_i32_0 : i32, i32
  }
  func.func @transform_3(%arg0: i32) -> (i32, i32) {
    %c0_i32 = arith.constant 0 : i32
    %c0_i32_0 = arith.constant 0 : i32
    %c0_i32_1 = arith.constant 0 : i32
    return %c0_i32, %c0_i32_0 : i32, i32
  }
  func.func @transform_4(%arg0: i32) -> (i32, i32) {
    %c0_i32 = arith.constant 0 : i32
    %c0_i32_0 = arith.constant 0 : i32
    %c0_i32_1 = arith.constant 0 : i32
    return %c0_i32, %c0_i32_0 : i32, i32
  }
  func.func @transform_5(%arg0: i32) -> (i32, i32) {
    %c0_i32 = arith.constant 0 : i32
    %c0_i32_0 = arith.constant 0 : i32
    %c0_i32_1 = arith.constant 0 : i32
    return %c0_i32, %c0_i32_0 : i32, i32
  }
  func.func @transform_6(%arg0: i32) -> (i32, i32) {
    %c0_i32 = arith.constant 0 : i32
    %c0_i32_0 = arith.constant 0 : i32
    %c0_i32_1 = arith.constant 0 : i32
    return %c0_i32, %c0_i32_0 : i32, i32
  }
  func.func @transform_7(%arg0: i32) -> (i32, i32) {
    %c0_i32 = arith.constant 0 : i32
    %c0_i32_0 = arith.constant 0 : i32
    %c0_i32_1 = arith.constant 0 : i32
    return %c0_i32, %c0_i32_0 : i32, i32
  }
  func.func @transform_8(%arg0: i32) -> (i32, i32) {
    %c0_i32 = arith.constant 0 : i32
    %c0_i32_0 = arith.constant 0 : i32
    %c0_i32_1 = arith.constant 0 : i32
    return %c0_i32, %c0_i32_0 : i32, i32
  }
  func.func @transform_9(%arg0: i32) -> (i32, i32) {
    %c0_i32 = arith.constant 0 : i32
    %c0_i32_0 = arith.constant 0 : i32
    return %arg0, %c0_i32 : i32, i32
  }
}

</mosaic_0001>

<bundles_post_ra>
// kernel: tpu_custom_call.1
= control target key start
LH: loop header
LB: loop body
LE: loop exit
PB: predicated region body
PF: predicated region fallthrough
CT: control target
= control target key end

     0   :  { %v569_v1 = vmov 0.0   ;;  %vm51_vm0 = vcmask 130048   ;;  %vm570_vm1 = vmmov 0   ;;  %s718_s0 = inlined_call_operand.vmem [shape: f32[8,16], index: 0, kind: input, shape index: {}]   ;;  %s719_s1 = inlined_call_operand.vmem [shape: bf16[16,64], index: 1, kind: input, shape index: {}]   ;;  %s720_s2 = inlined_call_operand.vmem [shape: f32[1,64], index: 2, kind: input, shape index: {}]   ;;  %s721_s3 = inlined_call_operand.vmem [shape: bf16[64,128], index: 3, kind: input, shape index: {}]   ;;  %s722_s4 = inlined_call_operand.vmem [shape: f32[1,128], index: 4, kind: input, shape index: {}]   ;;  %s723_s5 = inlined_call_operand.vmem [shape: bf16[128,64], index: 5, kind: input, shape index: {}]   ;;  %s724_s6 = inlined_call_operand.vmem [shape: f32[1,64], index: 6, kind: input, shape index: {}]   ;;  %s725_s7 = inlined_call_operand.vmem [shape: bf16[64,128], index: 7, kind: input, shape index: {}]   ;;  %s726_s8 = inlined_call_operand.vmem [shape: f32[1,128], index: 8, kind: input, shape index: {}]   ;;  %s727_s9 = inlined_call_operand.hbm [shape: f32[8,128], index: 9, kind: output, shape index: {}]  }
   0x1   :  { %v520_v0 = vld [vmem:[%s719_s1] sm:$0xff]   ;;  %467 = vmatprep.subr.bf16.mxu0 %v569_v1  ;;  %473 = vmatprep.subr.bf16.mxu1 %v569_v1 }
   0x2   :  { %v34_v2 = vld [vmem:[%s718_s0] sm:$0xff]  ;;  %468 = vmatpush3.bf16.msra.mxu0 %v520_v0  ;;  %469 = vmatprep.mubr.msk.bf16.mxu0 %vm570_vm1, %v569_v1 }
   0x3   :  { %v35_v3 = vpack.c.bf16 %v34_v2, %v34_v2  ;;  %481 = vmatprep.mubr.msk.bf16.mxu1 %vm570_vm1, %v569_v1  ;;  %485 = vmatprep.subr.bf16.mxu0 %v569_v1 }
   0x5   :  { %470 = vmatmul.mubr.msk.bf16.vlgmr.msra.gmra.mxu0 %vm51_vm0, %v35_v3 }
   0x6   :  { %501 = vmatprep.mubr.msk.bf16.mxu0 %vm570_vm1, %v569_v1 }
   0x7   :  { %14 = vsyncpa [#allocation3], 0  ;;  %v521_v4 = vld [vmem:[%s721_s3 + $0x18] sm:$0xff]   ;;  %v522_v5 = vld [vmem:[%s721_s3 + $0x10] sm:$0xff]   ;;  %vm142_vm3 = vcmask 523264  }
   0x8   :  { %474 = vmatpush3.bf16.msra.mxu1 %v521_v4  ;;  %v523_v6 = vld [vmem:[%s721_s3 + $0x8] sm:$0xff]   ;;  %v524_v7 = vld [vmem:[%s721_s3] sm:$0xff]   ;;  %v525_v8 = vld [vmem:[%s723_s5 + $0x38] sm:$0xff]  }
   0x9   :  { %475 = vmatprep.subr.bf16.mxu1 %v569_v1  ;;  %486 = vmatpush3.bf16.msra.mxu0 %v525_v8  ;;  %v419_v9 = vld [vmem:[%s720_s2] ss:$0 sm:$0xff]  ;;  %v526_v22 = vld [vmem:[%s723_s5 + $0x30] sm:$0xff]   ;;  %v527_v23 = vld [vmem:[%s723_s5 + $0x28] sm:$0xff]  }
   0xa   :  { %487 = vmatprep.subr.bf16.mxu0 %v569_v1  ;;  %v528_v24 = vld [vmem:[%s723_s5 + $0x20] sm:$0xff]   ;;  %v529_v25 = vld [vmem:[%s723_s5 + $0x18] sm:$0xff]   ;;  %v530_v26 = vld [vmem:[%s723_s5 + $0x10] sm:$0xff]  }
   0xb   :  { %v531_v27 = vld [vmem:[%s723_s5 + $0x8] sm:$0xff]   ;;  %v532_v28 = vld [vmem:[%s723_s5] sm:$0xff]   ;;  %v533_v42 = vld [vmem:[%s725_s7 + $0x18] sm:$0xff]  }
   0xc   :  { %476 = vmatpush3.bf16.msra.mxu1 %v522_v5  ;;  %v423_v29 = vld [vmem:[%s722_s4] ss:$0 sm:$0xff]  ;;  %v534_v43 = vld [vmem:[%s725_s7 + $0x10] sm:$0xff]   ;;  %v535_v44 = vld [vmem:[%s725_s7 + $0x8] sm:$0xff]  }
   0xd   :  { %477 = vmatprep.subr.bf16.mxu1 %v569_v1  ;;  %488 = vmatpush3.bf16.msra.mxu0 %v526_v22  ;;  %v536_v45 = vld [vmem:[%s725_s7] sm:$0xff]  }
   0xe   :  { %489 = vmatprep.subr.bf16.mxu0 %v569_v1  ;;  %v430_v46 = vld [vmem:[%s724_s6] ss:$0 sm:$0xff]  ;;  %s571_s6 = smov [#allocation2]  }
   0xf   :  { %v440_v59 = vld [vmem:[%s726_s8] ss:$0 sm:$0xff]  ;;  %s411_s2 = sshll.u32 %s571_s6, 4  ;;  %s412_s2 = int_to_ptr.vmem [resolvable:$true] %s411_s2 }
  0x10   :  { %478 = vmatpush3.bf16.msra.mxu1 %v523_v6  ;;  %s547_s8 = scalar_lea.vmem %s412_s2, 128  ;;  %p552_p1 = scmp.lt.s32.totalorder %s412_s2, %s412_s2 }
  0x11   :  { %479 = vmatprep.subr.bf16.mxu1 %v569_v1  ;;  %490 = vmatpush3.bf16.msra.mxu0 %v527_v23  ;;  %p548_p0 = scmp.ne.s32.totalorder %s412_s2, %s547_s8  ;;  %p553_p2 = scmp.lt.s32.totalorder %s547_s8, %s547_s8 }
  0x12   :  { %491 = vmatprep.subr.bf16.mxu0 %v569_v1 }
  0x13   :  { %p554_p3 = por %p553_p2, %p552_p1 }
  0x14   :  { %480 = vmatpush3.bf16.msra.mxu1 %v524_v7 }
  0x15   :  { %505 = vmatprep.subr.bf16.mxu1 %v569_v1  ;;  %492 = vmatpush3.bf16.msra.mxu0 %v528_v24  ;;  %p555_p4 = pnand %p554_p3, %p548_p0 }
  0x16   :  { %493 = vmatprep.subr.bf16.mxu0 %v569_v1 }
  0x19   :  { %494 = vmatpush3.bf16.msra.mxu0 %v529_v25 }
  0x1a   :  { %495 = vmatprep.subr.bf16.mxu0 %v569_v1 }
  0x1d   :  { %496 = vmatpush3.bf16.msra.mxu0 %v530_v26 }
  0x1e   :  { %497 = vmatprep.subr.bf16.mxu0 %v569_v1 }
  0x21   :  { %498 = vmatpush3.bf16.msra.mxu0 %v531_v27 }
  0x22   :  { %499 = vmatprep.subr.bf16.mxu0 %v569_v1 }
  0x25   :  { %500 = vmatpush3.bf16.msra.mxu0 %v532_v28 }
  0xc5   :  { %v89_v10 = vpop.f32.mrf.mxu0 }
  0xc6   :  { %v90_v11 = vadd.f32 %v419_v9, %v89_v10 }
  0xc7   :  { %v471_v12 = vpop.f32.mrf.mxu0 }
  0xc8   :  { %v96_v13 = vmul.f32 1.442695, %v90_v11  ;;  %vm95_vm2 = vcmp.gt.f32.partialorder %v90_v11, 0.0 }
  0xc9   :  { %v92_v14 = vpop.f32.mrf.mxu0 }
  0xca   :  { %537 = vpow2.f32 %v96_v13 }
  0xcb   :  { %v472_v15 = vpop.f32.mrf.mxu0 }
  0xd7   :  { %v538_v16 = vpop.eup %537 }
  0xd8   :  { %v422_v17 = vadd.f32 -1.0, %v538_v16 }
  0xda   :  { %v99_v18 = vmul.f32 1.6732632, %v422_v17 }
  0xdc   :  { %v100_v19 = vsel %vm95_vm2, %v90_v11, %v99_v18 }
  0xdd   :  { %v101_v20 = vmul.f32 1.050701, %v100_v19 }
  0xdf   :  { %v102_v21 = vpack.c.bf16 %v101_v20, %v101_v20 }
  0xe1   :  { %482 = vmatmul.mubr.msk.bf16.vlgmr.msra.gmra.mxu1 %vm142_vm3, %v102_v21 }
  0xe2   :  { %513 = vmatprep.mubr.msk.bf16.mxu1 %vm570_vm1, %v569_v1  ;;  %506 = vmatpush3.bf16.msra.mxu1 %v533_v42 }
  0xe3   :  { %507 = vmatprep.subr.bf16.mxu1 %v569_v1 }
  0xe6   :  { %508 = vmatpush3.bf16.msra.mxu1 %v534_v43 }
  0xe7   :  { %509 = vmatprep.subr.bf16.mxu1 %v569_v1 }
  0xea   :  { %510 = vmatpush3.bf16.msra.mxu1 %v535_v44 }
  0xeb   :  { %511 = vmatprep.subr.bf16.mxu1 %v569_v1 }
  0xee   :  { %512 = vmatpush3.bf16.msra.mxu1 %v536_v45 }
 0x1a1   :  { %v180_v30 = vpop.f32.mrf.mxu1 }
 0x1a2   :  { %v181_v31 = vadd.f32 %v423_v29, %v180_v30 }
 0x1a3   :  { %v483_v32 = vpop.f32.mrf.mxu1 }
 0x1a4   :  { %v187_v33 = vmul.f32 1.442695, %v181_v31  ;;  %vm186_vm4 = vcmp.gt.f32.partialorder %v181_v31, 0.0 }
 0x1a5   :  { %v183_v34 = vpop.f32.mrf.mxu1 }
 0x1a6   :  { %539 = vpow2.f32 %v187_v33 }
 0x1a7   :  { %v484_v35 = vpop.f32.mrf.mxu1 }
 0x1b3   :  { %v540_v36 = vpop.eup %539 }
 0x1b4   :  { %v429_v37 = vadd.f32 -1.0, %v540_v36 }
 0x1b6   :  { %v190_v38 = vmul.f32 1.6732632, %v429_v37 }
 0x1b8   :  { %v191_v39 = vsel %vm186_vm4, %v181_v31, %v190_v38 }
 0x1b9   :  { %v192_v40 = vmul.f32 1.050701, %v191_v39 }
 0x1bb   :  { %v193_v41 = vpack.c.bf16 %v192_v40, %v192_v40 }
 0x1bd   :  { %502 = vmatmul.mubr.bf16.vlgmr.msra.gmra.mxu0 %v193_v41 }
 0x27d   :  { %v299_v47 = vpop.f32.mrf.mxu0 }
 0x27e   :  { %v300_v48 = vadd.f32 %v430_v46, %v299_v47 }
 0x27f   :  { %v503_v49 = vpop.f32.mrf.mxu0 }
 0x280   :  { %v306_v50 = vmul.f32 1.442695, %v300_v48  ;;  %vm305_vm5 = vcmp.gt.f32.partialorder %v300_v48, 0.0 }
 0x281   :  { %v302_v51 = vpop.f32.mrf.mxu0 }
 0x282   :  { %541 = vpow2.f32 %v306_v50 }
 0x283   :  { %v504_v52 = vpop.f32.mrf.mxu0 }
 0x28f   :  { %v542_v53 = vpop.eup %541 }
 0x290   :  { %v439_v54 = vadd.f32 -1.0, %v542_v53 }
 0x292   :  { %v309_v55 = vmul.f32 1.6732632, %v439_v54 }
 0x294   :  { %v310_v56 = vsel %vm305_vm5, %v300_v48, %v309_v55 }
 0x295   :  { %v311_v57 = vmul.f32 1.050701, %v310_v56 }
 0x297   :  { %v312_v58 = vpack.c.bf16 %v311_v57, %v311_v57 }
 0x299   :  { %514 = vmatmul.mubr.msk.bf16.vlgmr.msra.gmra.mxu1 %vm142_vm3, %v312_v58 }
 0x359   :  { %v389_v60 = vpop.f32.mrf.mxu1 }
 0x35a   :  { %v390_v61 = vadd.f32 %v440_v59, %v389_v60 }
 0x35b   :  { %v515_v62 = vpop.f32.mrf.mxu1 }
 0x35c   :  { %395 = vmax.xlane.f32.xlu0 %v390_v61 }
 0x35d   :  { %v392_v63 = vpop.f32.mrf.mxu1 }
 0x35f   :  { %v516_v0 = vpop.f32.mrf.mxu1 }
 0x3e5   :  { %v396_v1 = vpop.xlane.xlu0 %395 }
 0x3e6   :  { %v397_v2 = vsub.f32 %v390_v61, %v396_v1 }
 0x3e8   :  { %v398_v3 = vmul.f32 1.442695, %v397_v2 }
 0x3ea   :  { %543 = vpow2.f32 %v398_v3 }
 0x3f7   :  { %v544_v4 = vpop.eup %543 }
 0x3f8   :  { %400 = vadd.xlane.f32.xlu0 %v544_v4 }
 0x481   :  { %v401_v5 = vpop.xlane.xlu0 %400 }
 0x482   :  { %545 = vrcp.f32 %v401_v5 }
 0x48f   :  { %v546_v6 = vpop.eup %545 }
 0x490   :  { %v403_v7 = vmul.f32 %v546_v6, %v544_v4 }
 0x492   :  { %404 = vst [vmem:[#allocation2] sm:$0xff] %v403_v7 }
 0x493   :  { %558 = shalt.err (!%p555_p4)
}
 0x494   :  { %414 = dma.vmem_to_hbm [thread:$0]  %s412_s2, 128, %s727_s9, [#allocation3]  }
 0x495   :  { %567 = dma.done.wait [#allocation3], 128  }
 0x496   :  { %568 = vsyncadd [#allocation3], 4294967168 }
 0x497   :  { %418 = vsyncpa [#allocation3], 1 }

</bundles_post_ra>
